<compile_context>
chip_gen: v6e
topology: v6e:2x2x1
jax: 0.10.0
libtpu: 0.0.40
codegen_flags: <defaults>
</compile_context>

<pallas_src>
import functools
import math

import jax
import jax.numpy as jnp
from jax import lax
from jax.experimental import pallas as pl
from jax.experimental.pallas import tpu as pltpu


def _round_up(x, m):
    return ((x + m - 1) // m) * m


# TODO(synk): PyTorch F.gelu defaults to the exact erf form; erf has no
# guaranteed Mosaic lowering, so the standard tanh approximation is used
# (max abs deviation ~1e-3, well inside test tolerance).
def _gelu_tanh(x):
    c = 0.7978845608028654  # sqrt(2/pi)
    return 0.5 * x * (1.0 + jnp.tanh(c * (x + 0.044715 * x * x * x)))


# ---------------------------------------------------------------------------
# Kernel 1: fused neighbor projections  H_cat = h @ [W | W_trans]^T + [b | b_t]
# ---------------------------------------------------------------------------
def _proj_kernel(h_ref, wcat_ref, bcat_ref, out_ref):
    acc = jnp.dot(h_ref[...], wcat_ref[...], preferred_element_type=jnp.float32)
    out_ref[...] = (acc + bcat_ref[...]).astype(out_ref.dtype)


# ---------------------------------------------------------------------------
# Kernel 2: out = gelu( A @ H1 + A^T @ H2 + (h @ W_self^T + b_self) )
# ---------------------------------------------------------------------------
def _agg_kernel(a_ik_ref, a_ki_ref, h1_ref, h2_ref, h_ref, wself_ref, bself_ref,
                o_ref, acc_ref, *, h_resident: bool):
    k = pl.program_id(1)

    @pl.when(k == 0)
    def _():
        # Self term once per row tile; W_self / b_self stay VMEM-resident.
        acc_ref[...] = (
            jnp.dot(h_ref[...], wself_ref[...], preferred_element_type=jnp.float32)
            + bself_ref[...]
        )

    if h_resident:
        # H1 / H2 are fully VMEM-resident; slice the current k chunk.
        tk = a_ik_ref.shape[1]
        off = pl.multiple_of(k * tk, tk)
        h1 = h1_ref[pl.ds(off, tk), :]
        h2 = h2_ref[pl.ds(off, tk), :]
    else:
        h1 = h1_ref[...]
        h2 = h2_ref[...]

    # Forward edges: A[i,k] @ H1[k]
    acc_ref[...] += jnp.dot(a_ik_ref[...], h1, preferred_element_type=jnp.float32)
    # Reverse edges: A[k,i]^T @ H2[k]  (transposed-LHS contraction; no A_T stream)
    acc_ref[...] += lax.dot_general(
        a_ki_ref[...], h2,
        dimension_numbers=(((0,), (0,)), ((), ())),
        preferred_element_type=jnp.float32)

    @pl.when(k == pl.num_programs(1) - 1)
    def _():
        o_ref[...] = _gelu_tanh(acc_ref[...]).astype(o_ref.dtype)


# ---------------------------------------------------------------------------
# Wrapper
# ---------------------------------------------------------------------------
@jax.jit
def bimpnn_layer(A, A_T, h_n, W, b_W, W_trans, b_trans, W_self, b_self):
    """BiMPNNLayer forward with dense A.

    A, A_T : (N, N)  (A_T must equal A.T, as in the PyTorch module)
    h_n    : (N, in_size)
    W*     : (out_size, in_size),  b* : (out_size,)
    Returns (N, out_size) float32.
    """
    del A_T  # transposed blocks are read directly from A (halves HBM traffic)

    f32, bf16 = jnp.float32, jnp.bfloat16
    N, in_size = h_n.shape
    out_size = W.shape[0]

    out_pad = _round_up(out_size, 128)  # lane-dense stores

    # Row tile TM / reduction tile TK (decoupled for large N).
    if N >= 1024:
        TM, TK = 256, 512
    elif N >= 256:
        TM, TK = 256, 256
    elif N >= 128:
        TM, TK = 128, 128
    else:
        # Tiny N: single full-extent block.
        # TODO(synk): for tiny N but large out_size, add a parallel grid axis
        # over out_pad tiles so v7x's second TensorCore gets work.
        TM = TK = _round_up(max(N, 8), 16)
    n_pad = _round_up(N, max(TM, TK))
    gm, gk = n_pad // TM, n_pad // TK

    # bf16 MXU operands (A is {0,1} -> exact); accumulation stays f32.
    h_p = h_n.astype(bf16)
    A_p = A.astype(bf16)
    if n_pad != N:  # pad only when needed
        h_p = jnp.pad(h_p, ((0, n_pad - N), (0, 0)))
        A_p = jnp.pad(A_p, ((0, n_pad - N), (0, n_pad - N)))

    # TODO(synk): the fused/padded weight blocks could be precomputed once at
    # parameter-setup time instead of on every call.
    def _pad_w(w, b):
        w = jnp.pad(w.astype(f32), ((0, out_pad - out_size), (0, 0)))
        b = jnp.pad(b.astype(f32), ((0, out_pad - out_size),))
        return w, b

    W_p, bW_p = _pad_w(W, b_W)
    Wt_p, bt_p = _pad_w(W_trans, b_trans)
    Ws_p, bs_p = _pad_w(W_self, b_self)

    w_cat_t = jnp.concatenate([W_p, Wt_p], axis=0).T.astype(bf16)  # (in, 2*out_pad)
    b_cat = jnp.concatenate([bW_p, bt_p])[None, :]                 # (1, 2*out_pad) f32
    wself_t = Ws_p.T.astype(bf16)                                  # (in, out_pad)
    b_self_p = bs_p[None, :]                                       # (1, out_pad) f32

    # --- kernel 1: H_cat = h @ [W | W_trans]^T + b  (bf16, feeds kernel 2 MXU)
    h_cat = pl.pallas_call(
        _proj_kernel,
        out_shape=jax.ShapeDtypeStruct((n_pad, 2 * out_pad), bf16),
        grid_spec=pltpu.PrefetchScalarGridSpec(
            num_scalar_prefetch=0,
            grid=(gm,),
            in_specs=[
                pl.BlockSpec((TM, in_size), lambda i: (i, 0)),
                pl.BlockSpec((in_size, 2 * out_pad), lambda i: (0, 0)),
                pl.BlockSpec((1, 2 * out_pad), lambda i: (0, 0)),
            ],
            out_specs=pl.BlockSpec((TM, 2 * out_pad), lambda i: (i, 0)),
        ),
        compiler_params=pltpu.CompilerParams(dimension_semantics=("parallel",)),
        cost_estimate=pl.CostEstimate(
            flops=2 * n_pad * in_size * 2 * out_pad,
            transcendentals=0,
            bytes_accessed=(2 * n_pad * in_size
                            + 2 * in_size * 2 * out_pad
                            + 4 * 2 * out_pad
                            + 2 * n_pad * 2 * out_pad),
        ),
    )(h_p, w_cat_t, b_cat)

    # --- kernel 2: aggregation + self term + GELU
    h_resident = (2 * n_pad * out_pad * 2) <= (4 << 20)
    if h_resident:
        h1_spec = pl.BlockSpec((n_pad, out_pad), lambda i, k: (0, 0))
        h2_spec = pl.BlockSpec((n_pad, out_pad), lambda i, k: (0, 1))
        h_bytes = 2 * n_pad * out_pad * 2
    else:
        h1_spec = pl.BlockSpec((TK, out_pad), lambda i, k: (k, 0))
        h2_spec = pl.BlockSpec((TK, out_pad), lambda i, k: (k, 1))
        h_bytes = gm * 2 * n_pad * out_pad * 2  # re-streamed once per row tile

    out_p = pl.pallas_call(
        functools.partial(_agg_kernel, h_resident=h_resident),
        out_shape=jax.ShapeDtypeStruct((n_pad, out_pad), f32),
        grid_spec=pltpu.PrefetchScalarGridSpec(
            num_scalar_prefetch=0,
            grid=(gm, gk),
            in_specs=[
                pl.BlockSpec((TM, TK), lambda i, k: (i, k)),        # A[i, k]
                pl.BlockSpec((TK, TM), lambda i, k: (k, i)),        # A[k, i]  (-> A^T)
                h1_spec,                                            # H1 cols of h_cat
                h2_spec,                                            # H2 cols of h_cat
                pl.BlockSpec((TM, in_size), lambda i, k: (i, 0)),   # h (self term)
                pl.BlockSpec((in_size, out_pad), lambda i, k: (0, 0)),  # W_self^T
                pl.BlockSpec((1, out_pad), lambda i, k: (0, 0)),        # b_self
            ],
            out_specs=pl.BlockSpec((TM, out_pad), lambda i, k: (i, 0)),
            scratch_shapes=[pltpu.VMEM((TM, out_pad), jnp.float32)],
        ),
        compiler_params=pltpu.CompilerParams(
            dimension_semantics=("parallel", "arbitrary"),
            vmem_limit_bytes=48 * 1024 * 1024,
        ),
        cost_estimate=pl.CostEstimate(
            flops=4 * n_pad * n_pad * out_pad + 2 * n_pad * in_size * out_pad,
            transcendentals=n_pad * out_pad,
            bytes_accessed=(2 * 2 * n_pad * n_pad      # A streamed twice (2 views), bf16
                            + h_bytes                  # H1/H2
                            + 2 * n_pad * in_size      # h (self term)
                            + 2 * in_size * out_pad + 4 * out_pad
                            + 4 * n_pad * out_pad),    # output
        ),
    )(A_p, A_p, h_cat, h_cat, h_p, wself_t, b_self_p)

    return out_p[:N, :out_size]


# ---------------------------------------------------------------------------
# Pure-JAX reference (mirrors the PyTorch forward with dense A, f32)
# ---------------------------------------------------------------------------
def bimpnn_ref(A, A_T, h_n, W, b_W, W_trans, b_trans, W_self, b_self):
    hp = jax.lax.Precision.HIGHEST
    h1 = jnp.dot(h_n, W.T, precision=hp) + b_W
    h2 = jnp.dot(h_n, W_trans.T, precision=hp) + b_trans
    h3 = jnp.dot(h_n, W_self.T, precision=hp) + b_self
    pre = jnp.dot(A, h1, precision=hp) + jnp.dot(A_T, h2, precision=hp) + h3
    return _gelu_tanh(pre)


if __name__ == "__main__":
    N, in_size, out_size = 16, 32, 32

    key = jax.random.PRNGKey(0)
    keys = jax.random.split(key, 8)

    h_n = jax.random.normal(keys[0], (N, in_size), dtype=jnp.float32)

    # Random DAG adjacency (strictly upper-triangular, ~30% density), dense f32.
    mask = jax.random.uniform(keys[1], (N, N)) < 0.3
    A = jnp.triu(mask, k=1).astype(jnp.float32)
    A_T = A.T

    bound = 1.0 / math.sqrt(in_size)
    W = jax.random.uniform(keys[2], (out_size, in_size), minval=-bound, maxval=bound, dtype=jnp.float32)
    b_W = jax.random.uniform(keys[3], (out_size,), minval=-bound, maxval=bound, dtype=jnp.float32)
    W_trans = jax.random.uniform(keys[4], (out_size, in_size), minval=-bound, maxval=bound, dtype=jnp.float32)
    b_trans = jax.random.uniform(keys[5], (out_size,), minval=-bound, maxval=bound, dtype=jnp.float32)
    W_self = jax.random.uniform(keys[6], (out_size, in_size), minval=-bound, maxval=bound, dtype=jnp.float32)
    b_self = jax.random.uniform(keys[7], (out_size,), minval=-bound, maxval=bound, dtype=jnp.float32)

    out = bimpnn_layer(A, A_T, h_n, W, b_W, W_trans, b_trans, W_self, b_self)
    out = jax.block_until_ready(out)

    ref = bimpnn_ref(A, A_T, h_n, W, b_W, W_trans, b_trans, W_self, b_self)
    assert out.shape == (N, out_size), out.shape
    max_err = float(jnp.max(jnp.abs(out - ref)))
    # Tolerance accounts for bf16 MXU operands (f32 accumulation) + tanh GELU.
    assert jnp.allclose(out, ref, atol=5e-2, rtol=2e-2), (
        f"mismatch vs reference, max abs err {max_err}")

    print("KERNEL_OK")
</pallas_src>

<mosaic_0001>
module attributes {stable_mosaic.version = 11 : i64} {
  func.func @_proj_kernel(%arg0: i32, %arg1: memref<16x32xbf16, #tpu.memory_space<vmem>>, %arg2: memref<32x256xbf16, #tpu.memory_space<vmem>>, %arg3: memref<1x256xf32, #tpu.memory_space<vmem>>, %arg4: memref<16x256xbf16, #tpu.memory_space<vmem>>) attributes {dimension_semantics = [#tpu.dimension_semantics<parallel>], iteration_bounds = array<i64: 1>, scalar_prefetch = 0 : i64, scratch_operands = 0 : i64, tpu.core_type = #tpu.core_type<tc>, window_params = [{transform_indices = @transform_0, window_bounds = array<i64: 16, 32>}, {pipeline_mode = #tpu.pipeline_mode<synchronous>, transform_indices = @transform_1, window_bounds = array<i64: 32, 256>}, {pipeline_mode = #tpu.pipeline_mode<synchronous>, transform_indices = @transform_2, window_bounds = array<i64: 1, 256>}, {transform_indices = @transform_3, window_bounds = array<i64: 16, 256>}]} {
    %c0 = arith.constant 0 : index
    %c0_0 = arith.constant 0 : index
    %0 = vector.load %arg1[%c0, %c0_0] : memref<16x32xbf16, #tpu.memory_space<vmem>>, vector<16x32xbf16>
    %c0_1 = arith.constant 0 : index
    %c0_2 = arith.constant 0 : index
    %1 = vector.load %arg2[%c0_1, %c0_2] : memref<32x256xbf16, #tpu.memory_space<vmem>>, vector<32x256xbf16>
    %cst = arith.constant dense<0.000000e+00> : vector<16x256xf32>
    %2 = tpu.matmul %0, %1, %cst {dimension_numbers = #tpu.dot_dimension_numbers<[1], [0], [0], [1], [0, 0, 1, 1], [], []>} : vector<16x32xbf16>, vector<32x256xbf16>, vector<16x256xf32> -> vector<16x256xf32>
    %c0_3 = arith.constant 0 : index
    %c0_4 = arith.constant 0 : index
    %3 = vector.load %arg3[%c0_3, %c0_4] : memref<1x256xf32, #tpu.memory_space<vmem>>, vector<1x256xf32>
    %4 = vector.broadcast %3 : vector<1x256xf32> to vector<16x256xf32>
    %5 = arith.addf %2, %4 : vector<16x256xf32>
    %6 = arith.truncf %5 : vector<16x256xf32> to vector<16x256xbf16>
    %c0_5 = arith.constant 0 : index
    %c0_6 = arith.constant 0 : index
    %7 = vector.load %arg4[%c0_5, %c0_6] : memref<16x256xbf16, #tpu.memory_space<vmem>>, vector<16x256xbf16>
    tpu.vector_store %arg4[%c0_5, %c0_6], %6 {strides = array<i32>} : memref<16x256xbf16, #tpu.memory_space<vmem>>, vector<16x256xbf16>,
    return
  }
  func.func @transform_0(%arg0: i32) -> (i32, i32) {
    %c0_i32 = arith.constant 0 : i32
    %c0_i32_0 = arith.constant 0 : i32
    return %arg0, %c0_i32 : i32, i32
  }
  func.func @transform_1(%arg0: i32) -> (i32, i32) {
    %c0_i32 = arith.constant 0 : i32
    %c0_i32_0 = arith.constant 0 : i32
    %c0_i32_1 = arith.constant 0 : i32
    return %c0_i32, %c0_i32_0 : i32, i32
  }
  func.func @transform_2(%arg0: i32) -> (i32, i32) {
    %c0_i32 = arith.constant 0 : i32
    %c0_i32_0 = arith.constant 0 : i32
    %c0_i32_1 = arith.constant 0 : i32
    return %c0_i32, %c0_i32_0 : i32, i32
  }
  func.func @transform_3(%arg0: i32) -> (i32, i32) {
    %c0_i32 = arith.constant 0 : i32
    %c0_i32_0 = arith.constant 0 : i32
    return %arg0, %c0_i32 : i32, i32
  }
}

module attributes {stable_mosaic.version = 11 : i64} {
  func.func @_agg_kernel(%arg0: i32, %arg1: i32, %arg2: memref<16x16xbf16, #tpu.memory_space<vmem>>, %arg3: memref<16x16xbf16, #tpu.memory_space<vmem>>, %arg4: memref<16x128xbf16, #tpu.memory_space<vmem>>, %arg5: memref<16x128xbf16, #tpu.memory_space<vmem>>, %arg6: memref<16x32xbf16, #tpu.memory_space<vmem>>, %arg7: memref<32x128xbf16, #tpu.memory_space<vmem>>, %arg8: memref<1x128xf32, #tpu.memory_space<vmem>>, %arg9: memref<16x128xf32, #tpu.memory_space<vmem>>, %arg10: memref<16x128xf32, #tpu.memory_space<vmem>>) attributes {dimension_semantics = [#tpu.dimension_semantics<parallel>, #tpu.dimension_semantics<arbitrary>], iteration_bounds = array<i64: 1, 1>, scalar_prefetch = 0 : i64, scratch_operands = 1 : i64, tpu.core_type = #tpu.core_type<tc>, window_params = [{transform_indices = @transform_0, window_bounds = array<i64: 16, 16>}, {transform_indices = @transform_1, window_bounds = array<i64: 16, 16>}, {transform_indices = @transform_2, window_bounds = array<i64: 16, 128>}, {transform_indices = @transform_3, window_bounds = array<i64: 16, 128>}, {transform_indices = @transform_4, window_bounds = array<i64: 16, 32>}, {pipeline_mode = #tpu.pipeline_mode<synchronous>, transform_indices = @transform_5, window_bounds = array<i64: 32, 128>}, {pipeline_mode = #tpu.pipeline_mode<synchronous>, transform_indices = @transform_6, window_bounds = array<i64: 1, 128>}, {transform_indices = @transform_7, window_bounds = array<i64: 16, 128>}]} {
    %c0_i32 = arith.constant 0 : i32
    %0 = arith.cmpi eq, %arg1, %c0_i32 : i32
    %1 = arith.extui %0 : i1 to i32
    %c0_i32_0 = arith.constant 0 : i32
    %2 = arith.cmpi ne, %1, %c0_i32_0 : i32
    scf.if %2 {
      %c0_17 = arith.constant 0 : index
      %c0_18 = arith.constant 0 : index
      %22 = vector.load %arg6[%c0_17, %c0_18] : memref<16x32xbf16, #tpu.memory_space<vmem>>, vector<16x32xbf16>
      %c0_19 = arith.constant 0 : index
      %c0_20 = arith.constant 0 : index
      %23 = vector.load %arg7[%c0_19, %c0_20] : memref<32x128xbf16, #tpu.memory_space<vmem>>, vector<32x128xbf16>
      %cst_21 = arith.constant dense<0.000000e+00> : vector<16x128xf32>
      %24 = tpu.matmul %22, %23, %cst_21 {dimension_numbers = #tpu.dot_dimension_numbers<[1], [0], [0], [1], [0, 0, 1, 1], [], []>} : vector<16x32xbf16>, vector<32x128xbf16>, vector<16x128xf32> -> vector<16x128xf32>
      %c0_22 = arith.constant 0 : index
      %c0_23 = arith.constant 0 : index
      %25 = vector.load %arg8[%c0_22, %c0_23] : memref<1x128xf32, #tpu.memory_space<vmem>>, vector<1x128xf32>
      %26 = vector.broadcast %25 : vector<1x128xf32> to vector<16x128xf32>
      %27 = arith.addf %24, %26 : vector<16x128xf32>
      %c0_24 = arith.constant 0 : index
      %c0_25 = arith.constant 0 : index
      %28 = vector.load %arg10[%c0_24, %c0_25] : memref<16x128xf32, #tpu.memory_space<vmem>>, vector<16x128xf32>
      tpu.vector_store %arg10[%c0_24, %c0_25], %27 {strides = array<i32>} : memref<16x128xf32, #tpu.memory_space<vmem>>, vector<16x128xf32>,
    } else {
    }
    %c16_i32 = arith.constant 16 : i32
    %3 = arith.muli %arg1, %c16_i32 : i32
    %4 = tpu.assume_multiple %3, 16 : i32
    %5 = arith.index_cast %4 : i32 to index
    %c0 = arith.constant 0 : index
    %6 = vector.load %arg4[%5, %c0] : memref<16x128xbf16, #tpu.memory_space<vmem>>, vector<16x128xbf16>
    %7 = arith.index_cast %4 : i32 to index
    %c0_1 = arith.constant 0 : index
    %8 = vector.load %arg5[%7, %c0_1] : memref<16x128xbf16, #tpu.memory_space<vmem>>, vector<16x128xbf16>
    %c0_2 = arith.constant 0 : index
    %c0_3 = arith.constant 0 : index
    %9 = vector.load %arg10[%c0_2, %c0_3] : memref<16x128xf32, #tpu.memory_space<vmem>>, vector<16x128xf32>
    %c0_4 = arith.constant 0 : index
    %c0_5 = arith.constant 0 : index
    %10 = vector.load %arg2[%c0_4, %c0_5] : memref<16x16xbf16, #tpu.memory_space<vmem>>, vector<16x16xbf16>
    %cst = arith.constant dense<0.000000e+00> : vector<16x128xf32>
    %11 = tpu.matmul %10, %6, %cst {dimension_numbers = #tpu.dot_dimension_numbers<[1], [0], [0], [1], [0, 0, 1, 1], [], []>} : vector<16x16xbf16>, vector<16x128xbf16>, vector<16x128xf32> -> vector<16x128xf32>
    %12 = arith.addf %9, %11 : vector<16x128xf32>
    %c0_6 = arith.constant 0 : index
    %c0_7 = arith.constant 0 : index
    %13 = vector.load %arg10[%c0_6, %c0_7] : memref<16x128xf32, #tpu.memory_space<vmem>>, vector<16x128xf32>
    tpu.vector_store %arg10[%c0_6, %c0_7], %12 {strides = array<i32>} : memref<16x128xf32, #tpu.memory_space<vmem>>, vector<16x128xf32>,
    %c0_8 = arith.constant 0 : index
    %c0_9 = arith.constant 0 : index
    %14 = vector.load %arg10[%c0_8, %c0_9] : memref<16x128xf32, #tpu.memory_space<vmem>>, vector<16x128xf32>
    %c0_10 = arith.constant 0 : index
    %c0_11 = arith.constant 0 : index
    %15 = vector.load %arg3[%c0_10, %c0_11] : memref<16x16xbf16, #tpu.memory_space<vmem>>, vector<16x16xbf16>
    %cst_12 = arith.constant dense<0.000000e+00> : vector<16x128xf32>
    %16 = tpu.matmul %15, %8, %cst_12 {dimension_numbers = #tpu.dot_dimension_numbers<[0], [0], [1], [1], [0, 1, 1, 1], [], []>} : vector<16x16xbf16>, vector<16x128xbf16>, vector<16x128xf32> -> vector<16x128xf32>
    %17 = arith.addf %14, %16 : vector<16x128xf32>
    %c0_13 = arith.constant 0 : index
    %c0_14 = arith.constant 0 : index
    %18 = vector.load %arg10[%c0_13, %c0_14] : memref<16x128xf32, #tpu.memory_space<vmem>>, vector<16x128xf32>
    tpu.vector_store %arg10[%c0_13, %c0_14], %17 {strides = array<i32>} : memref<16x128xf32, #tpu.memory_space<vmem>>, vector<16x128xf32>,
    %c0_i32_15 = arith.constant 0 : i32
    %19 = arith.cmpi eq, %arg1, %c0_i32_15 : i32
    %20 = arith.extui %19 : i1 to i32
    %c0_i32_16 = arith.constant 0 : i32
    %21 = arith.cmpi ne, %20, %c0_i32_16 : i32
    scf.if %21 {
      %c0_17 = arith.constant 0 : index
      %c0_18 = arith.constant 0 : index
      %22 = vector.load %arg10[%c0_17, %c0_18] : memref<16x128xf32, #tpu.memory_space<vmem>>, vector<16x128xf32>
      %cst_19 = arith.constant 5.000000e-01 : f32
      %23 = vector.broadcast %cst_19 : f32 to vector<16x128xf32>
      %24 = arith.mulf %23, %22 : vector<16x128xf32>
      %cst_20 = arith.constant 4.471500e-02 : f32
      %25 = vector.broadcast %cst_20 : f32 to vector<16x128xf32>
      %26 = arith.mulf %25, %22 : vector<16x128xf32>
      %27 = arith.mulf %26, %22 : vector<16x128xf32>
      %28 = arith.mulf %27, %22 : vector<16x128xf32>
      %29 = arith.addf %22, %28 : vector<16x128xf32>
      %cst_21 = arith.constant 0.797884583 : f32
      %30 = vector.broadcast %cst_21 : f32 to vector<16x128xf32>
      %31 = arith.mulf %30, %29 : vector<16x128xf32>
      %32 = math.tanh %31 : vector<16x128xf32>
      %cst_22 = arith.constant 1.000000e+00 : f32
      %33 = vector.broadcast %cst_22 : f32 to vector<16x128xf32>
      %34 = arith.addf %33, %32 : vector<16x128xf32>
      %35 = arith.mulf %24, %34 : vector<16x128xf32>
      %c0_23 = arith.constant 0 : index
      %c0_24 = arith.constant 0 : index
      %36 = vector.load %arg9[%c0_23, %c0_24] : memref<16x128xf32, #tpu.memory_space<vmem>>, vector<16x128xf32>
      tpu.vector_store %arg9[%c0_23, %c0_24], %35 {strides = array<i32>} : memref<16x128xf32, #tpu.memory_space<vmem>>, vector<16x128xf32>,
    } else {
    }
    return
  }
  func.func @transform_0(%arg0: i32, %arg1: i32) -> (i32, i32) {
    %c0_i32 = arith.constant 0 : i32
    return %arg0, %arg1 : i32, i32
  }
  func.func @transform_1(%arg0: i32, %arg1: i32) -> (i32, i32) {
    %c0_i32 = arith.constant 0 : i32
    return %arg1, %arg0 : i32, i32
  }
  func.func @transform_2(%arg0: i32, %arg1: i32) -> (i32, i32) {
    %c0_i32 = arith.constant 0 : i32
    %c0_i32_0 = arith.constant 0 : i32
    %c0_i32_1 = arith.constant 0 : i32
    return %c0_i32, %c0_i32_0 : i32, i32
  }
  func.func @transform_3(%arg0: i32, %arg1: i32) -> (i32, i32) {
    %c0_i32 = arith.constant 0 : i32
    %c1_i32 = arith.constant 1 : i32
    %c0_i32_0 = arith.constant 0 : i32
    return %c0_i32, %c1_i32 : i32, i32
  }
  func.func @transform_4(%arg0: i32, %arg1: i32) -> (i32, i32) {
    %c0_i32 = arith.constant 0 : i32
    %c0_i32_0 = arith.constant 0 : i32
    return %arg0, %c0_i32 : i32, i32
  }
  func.func @transform_5(%arg0: i32, %arg1: i32) -> (i32, i32) {
    %c0_i32 = arith.constant 0 : i32
    %c0_i32_0 = arith.constant 0 : i32
    %c0_i32_1 = arith.constant 0 : i32
    return %c0_i32, %c0_i32_0 : i32, i32
  }
  func.func @transform_6(%arg0: i32, %arg1: i32) -> (i32, i32) {
    %c0_i32 = arith.constant 0 : i32
    %c0_i32_0 = arith.constant 0 : i32
    %c0_i32_1 = arith.constant 0 : i32
    return %c0_i32, %c0_i32_0 : i32, i32
  }
  func.func @transform_7(%arg0: i32, %arg1: i32) -> (i32, i32) {
    %c0_i32 = arith.constant 0 : i32
    %c0_i32_0 = arith.constant 0 : i32
    return %arg0, %c0_i32 : i32, i32
  }
}

</mosaic_0001>

<bundles_post_ra>
// kernel: bimpnn_layer.2
= control target key start
LH: loop header
LB: loop body
LE: loop exit
PB: predicated region body
PF: predicated region fallthrough
CT: control target
= control target key end

     0   :  { %v141_v1 = vmov 0   ;;  %vm58_vm0 = vcmask 261120   ;;  %v23_v6 = vlaneseq  ;;  %s186_s1 = inlined_call_operand.vmem [shape: bf16[32,256], index: 1, kind: input, shape index: {}]   ;;  %s187_s0 = inlined_call_operand.vmem [shape: bf16[16,32], index: 0, kind: input, shape index: {}]   ;;  %s188_s2 = inlined_call_operand.vmem [shape: f32[1,256], index: 2, kind: input, shape index: {}]   ;;  %s189_s3 = inlined_call_operand.vmem [shape: bf16[16,256], index: 3, kind: output, shape index: {}]  }
   0x1   :  { %v134_v0 = vld [vmem:[%s186_s1 + $0x14] ss:$8 sps:$4 sm:$0xff]   ;;  %94 = vmatprep.mubr.bf16.mxu0 %v141_v1  ;;  %v136_v2 = vld [vmem:[%s186_s1 + $0x10] ss:$8 sps:$4 sm:$0xff]   ;;  %v137_v3 = vld [vmem:[%s186_s1 + $0x4] ss:$8 sps:$4 sm:$0xff]  }
   0x2   :  { %74 = vmatprep.subr.bf16.mxu0 %v134_v0  ;;  %v139_v4 = vld [vmem:[%s186_s1] ss:$8 sps:$4 sm:$0xff]   ;;  %v24_v7 = vshrl.u32 %v23_v6, 7 }
   0x3   :  { %75 = vmatpush1.bf16.msra.mxu0 %v136_v2  ;;  %v140_v5 = vld [vmem:[%s187_s0] sm:$0xff]  }
   0x4   :  { %76 = vmatprep.subr.bf16.mxu0 %v137_v3  ;;  %v25_v8 = vsub.s32 0, %v24_v7  ;;  %v29_v9 = vsub.s32 1, %v24_v7  ;;  %v21_v10 = vld [vmem:[%s188_s2] sm:$0x3] }
   0x6   :  { %v26_v11 = vrot.slane %v21_v10, %v25_v8  ;;  %v30_v12 = vrot.slane %v21_v10, %v29_v9 }
   0x7   :  { %77 = vmatpush1.bf16.msra.mxu0 %v139_v4 }
   0xa   :  { %128 = vmatmul.mubr.msk.bf16.vlgmr.msra.gmra.mxu0 %vm58_vm0, %v140_v5 }
  0xca   :  { %v96_v13 = vpop.f32.mrf.mxu0 }
  0xcb   :  { %v97_v15 = vadd.f32 %v96_v13, %v26_v11 }
  0xcc   :  { %v98_v14 = vpop.f32.mrf.mxu0 }
  0xcd   :  { %v99_v16 = vadd.f32 %v98_v14, %v30_v12 }
  0xce   :  { %v100_v17 = vpop.f32.mrf.mxu0 }
  0xcf   :  { %v131_v18 = vpack.c.bf16 %v99_v16, %v97_v15  ;;  %v101_v20 = vadd.f32 %v100_v17, %v26_v11 }
  0xd0   :  { %v102_v19 = vpop.f32.mrf.mxu0 }
  0xd1   :  { %117 = vst [vmem:[%s189_s3] sm:$0xff] %v131_v18  ;;  %v103_v21 = vadd.f32 %v102_v19, %v30_v12 }
  0xd3   :  { %v132_v22 = vpack.c.bf16 %v103_v21, %v101_v20 }
  0xd5   :  { %118 = vst [vmem:[%s189_s3 + $0x8] sm:$0xff] %v132_v22 }

// kernel: bimpnn_layer.3
= control target key start
LH: loop header
LB: loop body
LE: loop exit
PB: predicated region body
PF: predicated region fallthrough
CT: control target
= control target key end

     0   :  { %v491_v1 = vmov 0.0   ;;  %vm492_vm0 = vmmov 0   ;;  %vm157_vm1 = vcmask 261120   ;;  %s572_s0 = inlined_call_operand.vmem [shape: bf16[16,16], index: 0, kind: input, shape index: {}, may-alias: {0,1}]   ;;  %s573_s1 = inlined_call_operand.vmem [shape: bf16[16,16], index: 1, kind: input, shape index: {}, may-alias: {0,1}]   ;;  %s574_s2 = inlined_call_operand.vmem [shape: bf16[16,256], index: 2, kind: input, shape index: {}, may-alias: {2,3}]   ;;  %s575_s3 = inlined_call_operand.vmem [shape: bf16[16,256], index: 3, kind: input, shape index: {}, may-alias: {2,3}]   ;;  %s576_s4 = inlined_call_operand.vmem [shape: bf16[16,32], index: 4, kind: input, shape index: {}]   ;;  %s577_s5 = inlined_call_operand.vmem [shape: bf16[32,128], index: 5, kind: input, shape index: {}]   ;;  %s578_s6 = inlined_call_operand.vmem [shape: f32[1,128], index: 6, kind: input, shape index: {}]   ;;  %s579_s7 = inlined_call_operand.hbm [shape: f32[16,128], index: 7, kind: output, shape index: {}]  }
   0x1   :  { %v458_v0 = vld [vmem:[%s573_s1] sm:$0xff]   ;;  %432 = vmatprep.subr.bf16.mxu0 %v491_v1  ;;  %v459_v2 = vld [vmem:[%s577_s5 + $0x8] sm:$0xff]   ;;  %440 = vmatprep.subr.bf16.mxu1 %v491_v1 }
   0x2   :  { %289 = vxpose.xlu0.c.b16.start.end [1/1] (short) (narrow) %v458_v0, 16  ;;  %v460_v3 = vld [vmem:[%s577_s5] sm:$0xff]   ;;  %436 = vmatprep.mubr.msk.bf16.mxu0 %vm492_vm0, %v491_v1  ;;  %v37_v5 = vld [vmem:[%s574_s2 + $0x8] sm:$0xf]  ;;  %v413_v8 = vld [vmem:[%s575_s3 + $0xc] sm:$0xf] }
   0x3   :  { %433 = vmatpush3.bf16.msra.mxu0 %v459_v2  ;;  %v35_v4 = vld [vmem:[%s574_s2] sm:$0xf]  ;;  %442 = vmatprep.mubr.msk.bf16.mxu1 %vm492_vm0, %v491_v1  ;;  %38 = vst [vmem:[#allocation3 + $0x4] sm:$0xf] %v37_v5  ;;  %v412_v7 = vld [vmem:[%s575_s3 + $0x4] sm:$0xf] }
   0x4   :  { %434 = vmatprep.subr.bf16.mxu0 %v491_v1  ;;  %36 = vst [vmem:[#allocation3] sm:$0xf] %v35_v4  ;;  %v462_v6 = vld [vmem:[%s576_s4] sm:$0xff]   ;;  %84 = vst [vmem:[#allocation4] sm:$0xf] %v412_v7 }
   0x5   :  { %86 = vst [vmem:[#allocation4 + $0x4] sm:$0xf] %v413_v8 }
   0x7   :  { %435 = vmatpush3.bf16.msra.mxu0 %v460_v3 }
   0x8   :  { %12 = vsyncpa [#allocation6], 0  ;;  %v463_v10 = vld [vmem:[%s572_s0] sm:$0xff]   ;;  %vm230_vm2 = vcmask 130048   ;;  %s493_s0 = smov [#allocation5]  }
   0x9   :  { %v414_v13 = vld [vmem:[%s578_s6] ss:$0 sm:$0xff]  ;;  %s389_s6 = sshll.u32 %s493_s0, 4  ;;  %s390_s6 = int_to_ptr.vmem [resolvable:$true] %s389_s6 }
   0xa   :  { %437 = vmatmul.mubr.msk.bf16.vlgmr.msra.gmra.mxu0 %vm157_vm1, %v462_v6  ;;  %s469_s16 = scalar_lea.vmem %s390_s6, 256  ;;  %p474_p1 = scmp.lt.s32.totalorder %s390_s6, %s390_s6 }
   0xb   :  { %v461_v9 = vld [vmem:[#allocation3] sm:$0xff]   ;;  %p470_p0 = scmp.ne.s32.totalorder %s390_s6, %s469_s16  ;;  %p475_p2 = scmp.lt.s32.totalorder %s469_s16, %s469_s16 }
   0xc   :  { %441 = vmatpush3.bf16.msra.mxu1 %v461_v9  ;;  %v464_v11 = vld [vmem:[#allocation4] sm:$0xff]  }
   0xd   :  { %446 = vmatprep.subr.bf16.mxu1 %v491_v1  ;;  %p476_p3 = por %p475_p2, %p474_p1 }
   0xf   :  { %443 = vmatmul.mubr.msk.bf16.vlgmr.msra.gmra.mxu1 %vm230_vm2, %v463_v10  ;;  %p477_p4 = pnand %p476_p3, %p470_p0 }
  0x10   :  { %447 = vmatpush3.bf16.msra.mxu1 %v464_v11  ;;  %448 = vmatprep.mubr.msk.bf16.mxu1 %vm492_vm0, %v491_v1 }
  0x64   :  { %v297_v12 = vpop.trf.xlu0 }
  0x65   :  { %449 = vmatmul.mubr.msk.bf16.vlgmr.msra.gmra.mxu1 %vm230_vm2, %v297_v12 }
  0xca   :  { %v195_v14 = vpop.f32.mrf.mxu0 }
  0xcb   :  { %v196_v16 = vadd.f32 %v414_v13, %v195_v14 }
  0xcc   :  { %v438_v15 = vpop.f32.mrf.mxu0 }
  0xce   :  { %v198_v17 = vpop.f32.mrf.mxu0 }
  0xcf   :  { %v268_v18 = vpop.f32.mrf.mxu1  ;;  %v199_v21 = vadd.f32 %v414_v13, %v198_v17 }
  0xd0   :  { %v439_v19 = vpop.f32.mrf.mxu0  ;;  %v275_v20 = vadd.f32 %v268_v18, %v196_v16 }
  0xd1   :  { %v444_v22 = vpop.f32.mrf.mxu1 }
  0xd3   :  { %v271_v23 = vpop.f32.mrf.mxu1 }
  0xd4   :  { %v276_v24 = vadd.f32 %v271_v23, %v199_v21 }
  0xd5   :  { %v445_v25 = vpop.f32.mrf.mxu1 }
 0x125   :  { %v348_v26 = vpop.f32.mrf.mxu1 }
 0x126   :  { %v355_v27 = vadd.f32 %v348_v26, %v275_v20 }
 0x127   :  { %v450_v28 = vpop.f32.mrf.mxu1 }
 0x128   :  { %v366_v29 = vmul.f32 0.044715, %v355_v27  ;;  %v364_v43 = vmul.f32 0.5, %v355_v27 }
 0x129   :  { %v351_v30 = vpop.f32.mrf.mxu1 }
 0x12a   :  { %v368_v31 = vmul.f32 %v366_v29, %v355_v27  ;;  %v356_v32 = vadd.f32 %v351_v30, %v276_v24 }
 0x12b   :  { %v451_v33 = vpop.f32.mrf.mxu1 }
 0x12c   :  { %v370_v34 = vmul.f32 %v368_v31, %v355_v27  ;;  %v367_v35 = vmul.f32 0.044715, %v356_v32  ;;  %v365_v47 = vmul.f32 0.5, %v356_v32 }
 0x12e   :  { %v372_v36 = vadd.f32 %v370_v34, %v355_v27  ;;  %v369_v37 = vmul.f32 %v367_v35, %v356_v32 }
 0x130   :  { %v374_v38 = vmul.f32 0.7978846, %v372_v36  ;;  %v371_v39 = vmul.f32 %v369_v37, %v356_v32 }
 0x132   :  { %465 = vtanh.f32 %v374_v38  ;;  %v373_v40 = vadd.f32 %v371_v39, %v356_v32 }
 0x134   :  { %v375_v41 = vmul.f32 0.7978846, %v373_v40 }
 0x136   :  { %467 = vtanh.f32 %v375_v41 }
 0x13f   :  { %v466_v42 = vpop.eup %465 }
 0x140   :  { %v378_v44 = vadd.f32 1.0, %v466_v42 }
 0x142   :  { %v380_v45 = vmul.f32 %v378_v44, %v364_v43 }
 0x143   :  { %v468_v46 = vpop.eup %467 }
 0x144   :  { %v379_v48 = vadd.f32 1.0, %v468_v46  ;;  %382 = vst [vmem:[#allocation5] sm:$0xff] %v380_v45 }
 0x146   :  { %v381_v49 = vmul.f32 %v379_v48, %v365_v47 }
 0x148   :  { %383 = vst [vmem:[#allocation5 + $0x8] sm:$0xff] %v381_v49 }
 0x149   :  { %480 = shalt.err (!%p477_p4)
}
 0x14a   :  { %s494_s17 = smov 128   ;;  %s495_s18 = smov 8  }
 0x14b   :  { %395 = dma.vmem_to_hbm [thread:$0]  %s390_s6, 256, %s579_s7, [#allocation6], %s494_s17, %s494_s17, %s495_s18  }
 0x14c   :  { %489 = dma.done.wait [#allocation6], 256  }
 0x14d   :  { %490 = vsyncadd [#allocation6], 4294967040 }
 0x14e   :  { %399 = vsyncpa [#allocation6], 1 }

</bundles_post_ra>
